<compile_context>
chip_gen: v7x
topology: tpu7x:2x2x1
jax: 0.10.0
libtpu: 0.0.40
codegen_flags: <defaults>
</compile_context>

<pallas_src>
import functools
import math

import jax
import jax.numpy as jnp
from jax.experimental import pallas as pl
from jax.experimental.pallas import tpu as pltpu

LEAKY_SLOPE = 0.01          # F.leaky_relu default negative_slope
BN_EPS = 1e-5               # nn.BatchNorm1d default eps
LOG_2PI = math.log(2.0 * math.pi)
LANE = 128


def _round_up(x, m=LANE):
    return ((x + m - 1) // m) * m


def _leaky_relu(x):
    return jnp.where(x >= 0, x, LEAKY_SLOPE * x)


def _batch_norm_train(x, gamma, beta):
    # BatchNorm1d (training mode): batch statistics, biased variance.
    mu = jnp.mean(x, axis=0, keepdims=True)
    var = jnp.mean(jnp.square(x - mu), axis=0, keepdims=True)
    return gamma * (x - mu) * jax.lax.rsqrt(var + BN_EPS) + beta


def ppo_kernel(state_ref, noise_ref, w_in_ref, w_h_ref, w_pb_ref,
               w_bd_ref, w_hd_ref, pk_ref, out_ref, *, A, H1p, H2p, H3p):
    f32 = jnp.float32
    bf16 = w_in_ref.dtype        # matmul operand dtype (bf16)

    x = state_ref[...].astype(bf16)

    # x = leaky_relu(batch_norm_input(input(x)))
    h = jnp.dot(x, w_in_ref[...], preferred_element_type=f32) + pk_ref[0:1, 0:H1p]
    h = _leaky_relu(_batch_norm_train(h, pk_ref[1:2, 0:H1p], pk_ref[2:3, 0:H1p]))

    # x = leaky_relu(batch_norm(hidden(x)))
    h = jnp.dot(h.astype(bf16), w_h_ref[...], preferred_element_type=f32) + pk_ref[3:4, 0:H2p]
    h = _leaky_relu(_batch_norm_train(h, pk_ref[4:5, 0:H2p], pk_ref[5:6, 0:H2p]))

    # x = leaky_relu(policy_body(x))
    h = _leaky_relu(jnp.dot(h.astype(bf16), w_pb_ref[...], preferred_element_type=f32)
                    + pk_ref[6:7, 0:H3p])

    # fused actor_body | critic_body -> (B, 2*H3p)
    bd = _leaky_relu(jnp.dot(h.astype(bf16), w_bd_ref[...], preferred_element_type=f32)
                     + pk_ref[7:8, 0:2 * H3p])

    # fused heads; the column layout of w_hd already places:
    #   lanes 0:A   actor_head (pre-tanh, copy #1 -> action base)
    #   lanes A:2A  actor_head (pre-tanh, copy #2 -> mean)
    #   lane 2A+2   critic_head (value)
    hd = jnp.dot(bd.astype(bf16), w_hd_ref[...], preferred_element_type=f32) + pk_ref[8:9, 0:LANE]

    lane = jax.lax.broadcasted_iota(jnp.int32, hd.shape, 1)
    # tanh on actor lanes, raw value on the critic lane; tanh(0)=0 elsewhere.
    base = jnp.where(lane == 2 * A + 2, hd, jnp.tanh(hd))

    # Normal(mean, softplus(std)): sample / log_prob / entropy.
    scale = pk_ref[9:10, 0:LANE]     # softplus(std) in lanes 0:A, 1.0 padding
    noise = noise_ref[...]           # eps in lanes 0:A, 0.0 padding
    sum_log_scale = jnp.sum(jnp.log(scale))          # padded lanes: log(1)=0
    logp = (-0.5 * jnp.sum(noise * noise, axis=-1, keepdims=True)
            - sum_log_scale - 0.5 * A * LOG_2PI)                    # (B, 1)
    ent = A * (0.5 + 0.5 * LOG_2PI) + sum_log_scale                 # scalar

    out = (base
           + scale * noise                                          # -> action in lanes 0:A
           + jnp.where(lane == 2 * A, logp, 0.0)
           + jnp.where(lane == 2 * A + 1, ent, 0.0))
    out_ref[...] = out                                              # one unmasked (B,128) store


def init_params(key, state_size, action_size, hidden_size):
    second = hidden_size - 100
    third = second - 100
    assert third > 0, "hidden_size must exceed 200"

    def linear(k, fan_in, fan_out):
        kw, kb = jax.random.split(k)
        w = (2.0 / fan_in) ** 0.5 * jax.random.normal(kw, (fan_in, fan_out), jnp.float32)
        b = 0.1 * jax.random.normal(kb, (fan_out,), jnp.float32)
        return w, b

    keys = jax.random.split(key, 7)
    p = {}
    p["w_in"], p["b_in"] = linear(keys[0], state_size, hidden_size)
    p["w_h"], p["b_h"] = linear(keys[1], hidden_size, second)
    p["w_pb"], p["b_pb"] = linear(keys[2], second, third)
    p["w_ab"], p["b_ab"] = linear(keys[3], third, third)
    p["w_ah"], p["b_ah"] = linear(keys[4], third, action_size)
    p["w_cb"], p["b_cb"] = linear(keys[5], third, third)
    p["w_ch"], p["b_ch"] = linear(keys[6], third, 1)
    # BatchNorm affine params (PyTorch default: gamma=1, beta=0)
    p["g_bni"] = jnp.ones((hidden_size,), jnp.float32)
    p["be_bni"] = jnp.zeros((hidden_size,), jnp.float32)
    p["g_bn"] = jnp.ones((second,), jnp.float32)
    p["be_bn"] = jnp.zeros((second,), jnp.float32)
    # self.std = nn.Parameter(torch.zeros(4))
    p["std"] = jnp.zeros((action_size,), jnp.float32)
    return p


def pack_params(p, state_size, action_size, hidden_size, w_dtype=jnp.bfloat16):
    H1 = hidden_size
    H2 = hidden_size - 100
    H3 = H2 - 100
    A = action_size
    assert 2 * A + 3 <= LANE, "action_size too large for the single output slab"
    Sp, H1p, H2p, H3p = (_round_up(v) for v in (state_size, H1, H2, H3))
    Wp = max(H1p, 2 * H3p, LANE)

    def pad2(w, rp, cp):
        r, c = w.shape
        return jnp.pad(w, ((0, rp - r), (0, cp - c)))

    w_in = pad2(p["w_in"], Sp, H1p).astype(w_dtype)
    w_h = pad2(p["w_h"], H1p, H2p).astype(w_dtype)
    w_pb = pad2(p["w_pb"], H2p, H3p).astype(w_dtype)

    # fused actor_body | critic_body
    w_bd = jnp.zeros((H3p, 2 * H3p), jnp.float32)
    w_bd = w_bd.at[:H3, :H3].set(p["w_ab"])
    w_bd = w_bd.at[:H3, H3p:H3p + H3].set(p["w_cb"])
    w_bd = w_bd.astype(w_dtype)

    # fused heads, block-structured; actor head duplicated so that action-base
    # and mean land in distinct output lanes, value lands in lane 2A+2.
    w_hd = jnp.zeros((2 * H3p, LANE), jnp.float32)
    w_hd = w_hd.at[:H3, 0:A].set(p["w_ah"])
    w_hd = w_hd.at[:H3, A:2 * A].set(p["w_ah"])
    w_hd = w_hd.at[H3p:H3p + H3, 2 * A + 2:2 * A + 3].set(p["w_ch"])
    w_hd = w_hd.astype(w_dtype)

    def row(vec, fill=0.0):
        r = jnp.full((Wp,), fill, jnp.float32)
        return r.at[:vec.shape[0]].set(vec)

    b_bodies = jnp.zeros((Wp,), jnp.float32)
    b_bodies = b_bodies.at[:H3].set(p["b_ab"]).at[H3p:H3p + H3].set(p["b_cb"])

    b_head = jnp.zeros((Wp,), jnp.float32)
    b_head = b_head.at[0:A].set(p["b_ah"]).at[A:2 * A].set(p["b_ah"])
    b_head = b_head.at[2 * A + 2].set(p["b_ch"][0])

    # stable softplus in the wrapper; padding with 1.0 keeps log(scale)=0 there.
    scale_row = row(jax.nn.softplus(p["std"]), fill=1.0)

    rows = [row(p["b_in"]), row(p["g_bni"]), row(p["be_bni"]),
            row(p["b_h"]), row(p["g_bn"]), row(p["be_bn"]),
            row(p["b_pb"]), b_bodies, b_head, scale_row]
    n_rows = _round_up(len(rows), 8)
    pk = jnp.stack(rows + [jnp.zeros((Wp,), jnp.float32)] * (n_rows - len(rows)))

    dims = dict(A=A, S=state_size, Sp=Sp, H1p=H1p, H2p=H2p, H3p=H3p, Wp=Wp)
    packed = dict(w_in=w_in, w_h=w_h, w_pb=w_pb, w_bd=w_bd, w_hd=w_hd, pk=pk)
    return packed, dims


def ppo_forward(state, noise, packed, dims):
    """Runs the whole PPONetwork forward as one fused Pallas kernel."""
    # TODO(synk): for large batches add a batch-tiled grid with "parallel"
    # semantics (v7x dual-TC); requires hoisting training-mode BN statistics
    # out of the per-tile body, so keep grid-less at small batch for correctness.
    B = state.shape[0]
    A, S, Sp = dims["A"], dims["S"], dims["Sp"]
    H1p, H2p, H3p = dims["H1p"], dims["H2p"], dims["H3p"]

    state_p = jnp.pad(state.astype(jnp.float32), ((0, 0), (0, Sp - S)))
    noise_p = jnp.pad(noise.astype(jnp.float32), ((0, 0), (0, LANE - A)))

    kernel = functools.partial(ppo_kernel, A=A, H1p=H1p, H2p=H2p, H3p=H3p)
    vmem = pl.BlockSpec(memory_space=pltpu.MemorySpace.VMEM)

    args = (state_p, noise_p, packed["w_in"], packed["w_h"], packed["w_pb"],
            packed["w_bd"], packed["w_hd"], packed["pk"])

    flops = 2 * B * (Sp * H1p + H1p * H2p + H2p * H3p + H3p * 2 * H3p + 2 * H3p * LANE)
    bytes_accessed = int(sum(a.size * a.dtype.itemsize for a in args) + B * LANE * 4)
    cost = pl.CostEstimate(flops=int(flops), transcendentals=int(B * LANE + LANE),
                           bytes_accessed=bytes_accessed)

    out = pl.pallas_call(
        kernel,
        out_shape=jax.ShapeDtypeStruct((B, LANE), jnp.float32),
        in_specs=[vmem] * len(args),
        out_specs=vmem,
        cost_estimate=cost,
    )(*args)

    return {
        "a": out[:, 0:A],
        "log_pi_a": out[:, 2 * A:2 * A + 1],
        "ent": out[:, 2 * A + 1:2 * A + 2],
        "mean": out[:, A:2 * A],
        "v": out[:, 2 * A + 2:2 * A + 3],
    }


if __name__ == "__main__":
    # action_size must be 4 (std has 4 entries); hidden_size > 200.
    STATE_SIZE = 16
    ACTION_SIZE = 4
    HIDDEN_SIZE = 228   # -> second_hidden_size=128, third=28
    BATCH = 8

    key = jax.random.PRNGKey(0)
    k_params, k_state, k_noise = jax.random.split(key, 3)

    params = init_params(k_params, STATE_SIZE, ACTION_SIZE, HIDDEN_SIZE)
    packed, dims = pack_params(params, STATE_SIZE, ACTION_SIZE, HIDDEN_SIZE)

    state = jax.random.normal(k_state, (BATCH, STATE_SIZE), jnp.float32)
    noise = jax.random.normal(k_noise, (BATCH, ACTION_SIZE), jnp.float32)

    out = ppo_forward(state, noise, packed, dims)
    jax.block_until_ready(out)

    assert out["a"].shape == (BATCH, ACTION_SIZE)
    assert out["log_pi_a"].shape == (BATCH, 1)
    assert out["ent"].shape == (BATCH, 1)
    assert out["mean"].shape == (BATCH, ACTION_SIZE)
    assert out["v"].shape == (BATCH, 1)
    print("KERNEL_OK")
</pallas_src>

<mosaic_0001>
module attributes {stable_mosaic.version = 11 : i64} {
  func.func @ppo_kernel(%arg0: memref<8x128xf32, #tpu.memory_space<vmem>>, %arg1: memref<8x128xf32, #tpu.memory_space<vmem>>, %arg2: memref<128x256xbf16, #tpu.memory_space<vmem>>, %arg3: memref<256x128xbf16, #tpu.memory_space<vmem>>, %arg4: memref<128x128xbf16, #tpu.memory_space<vmem>>, %arg5: memref<128x256xbf16, #tpu.memory_space<vmem>>, %arg6: memref<256x128xbf16, #tpu.memory_space<vmem>>, %arg7: memref<16x256xf32, #tpu.memory_space<vmem>>, %arg8: memref<8x128xf32, #tpu.memory_space<vmem>>) attributes {dimension_semantics = [], scalar_prefetch = 0 : i64, scratch_operands = 0 : i64, tpu.core_type = #tpu.core_type<tc>} {
    %c0 = arith.constant 0 : index
    %c0_0 = arith.constant 0 : index
    %0 = vector.load %arg0[%c0, %c0_0] : memref<8x128xf32, #tpu.memory_space<vmem>>, vector<8x128xf32>
    %1 = arith.truncf %0 : vector<8x128xf32> to vector<8x128xbf16>
    %c0_1 = arith.constant 0 : index
    %c0_2 = arith.constant 0 : index
    %2 = vector.load %arg2[%c0_1, %c0_2] : memref<128x256xbf16, #tpu.memory_space<vmem>>, vector<128x256xbf16>
    %cst = arith.constant dense<0.000000e+00> : vector<8x256xf32>
    %3 = tpu.matmul %1, %2, %cst {dimension_numbers = #tpu.dot_dimension_numbers<[1], [0], [0], [1], [0, 0, 1, 1], [], []>} : vector<8x128xbf16>, vector<128x256xbf16>, vector<8x256xf32> -> vector<8x256xf32>
    %c0_3 = arith.constant 0 : index
    %c0_4 = arith.constant 0 : index
    %4 = vector.load %arg7[%c0_3, %c0_4] : memref<16x256xf32, #tpu.memory_space<vmem>>, vector<1x256xf32>
    %5 = vector.broadcast %4 : vector<1x256xf32> to vector<8x256xf32>
    %6 = arith.addf %3, %5 : vector<8x256xf32>
    %c1 = arith.constant 1 : index
    %c0_5 = arith.constant 0 : index
    %7 = vector.load %arg7[%c1, %c0_5] : memref<16x256xf32, #tpu.memory_space<vmem>>, vector<1x256xf32>
    %c2 = arith.constant 2 : index
    %c0_6 = arith.constant 0 : index
    %8 = vector.load %arg7[%c2, %c0_6] : memref<16x256xf32, #tpu.memory_space<vmem>>, vector<1x256xf32>
    %cst_7 = arith.constant dense<0.000000e+00> : vector<256xf32>
    %9 = vector.multi_reduction <add>, %6, %cst_7 [0] : vector<8x256xf32> to vector<256xf32>
    %10 = vector.shape_cast %9 : vector<256xf32> to vector<1x256xf32>
    %cst_8 = arith.constant 8.000000e+00 : f32
    %11 = vector.broadcast %cst_8 : f32 to vector<1x256xf32>
    %12 = arith.divf %10, %11 : vector<1x256xf32>
    %13 = vector.broadcast %12 : vector<1x256xf32> to vector<8x256xf32>
    %14 = arith.subf %6, %13 : vector<8x256xf32>
    %15 = arith.mulf %14, %14 : vector<8x256xf32>
    %cst_9 = arith.constant dense<0.000000e+00> : vector<256xf32>
    %16 = vector.multi_reduction <add>, %15, %cst_9 [0] : vector<8x256xf32> to vector<256xf32>
    %17 = vector.shape_cast %16 : vector<256xf32> to vector<1x256xf32>
    %cst_10 = arith.constant 8.000000e+00 : f32
    %18 = vector.broadcast %cst_10 : f32 to vector<1x256xf32>
    %19 = arith.divf %17, %18 : vector<1x256xf32>
    %20 = vector.broadcast %12 : vector<1x256xf32> to vector<8x256xf32>
    %21 = arith.subf %6, %20 : vector<8x256xf32>
    %22 = vector.broadcast %7 : vector<1x256xf32> to vector<8x256xf32>
    %23 = arith.mulf %22, %21 : vector<8x256xf32>
    %cst_11 = arith.constant 9.99999974E-6 : f32
    %24 = vector.broadcast %cst_11 : f32 to vector<1x256xf32>
    %25 = arith.addf %19, %24 : vector<1x256xf32>
    %26 = math.rsqrt %25 : vector<1x256xf32>
    %27 = vector.broadcast %26 : vector<1x256xf32> to vector<8x256xf32>
    %28 = arith.mulf %23, %27 : vector<8x256xf32>
    %29 = vector.broadcast %8 : vector<1x256xf32> to vector<8x256xf32>
    %30 = arith.addf %28, %29 : vector<8x256xf32>
    %cst_12 = arith.constant 0.000000e+00 : f32
    %31 = vector.broadcast %cst_12 : f32 to vector<8x256xf32>
    %32 = arith.cmpf oge, %30, %31 : vector<8x256xf32>
    %cst_13 = arith.constant 0.00999999977 : f32
    %33 = vector.broadcast %cst_13 : f32 to vector<8x256xf32>
    %34 = arith.mulf %33, %30 : vector<8x256xf32>
    %35 = arith.select %32, %30, %34 : vector<8x256xi1>, vector<8x256xf32>
    %36 = arith.truncf %35 : vector<8x256xf32> to vector<8x256xbf16>
    %c0_14 = arith.constant 0 : index
    %c0_15 = arith.constant 0 : index
    %37 = vector.load %arg3[%c0_14, %c0_15] : memref<256x128xbf16, #tpu.memory_space<vmem>>, vector<256x128xbf16>
    %cst_16 = arith.constant dense<0.000000e+00> : vector<8x128xf32>
    %38 = tpu.matmul %36, %37, %cst_16 {dimension_numbers = #tpu.dot_dimension_numbers<[1], [0], [0], [1], [0, 0, 1, 1], [], []>} : vector<8x256xbf16>, vector<256x128xbf16>, vector<8x128xf32> -> vector<8x128xf32>
    %c3 = arith.constant 3 : index
    %c0_17 = arith.constant 0 : index
    %39 = vector.load %arg7[%c3, %c0_17] : memref<16x256xf32, #tpu.memory_space<vmem>>, vector<1x128xf32>
    %40 = vector.broadcast %39 : vector<1x128xf32> to vector<8x128xf32>
    %41 = arith.addf %38, %40 : vector<8x128xf32>
    %c4 = arith.constant 4 : index
    %c0_18 = arith.constant 0 : index
    %42 = vector.load %arg7[%c4, %c0_18] : memref<16x256xf32, #tpu.memory_space<vmem>>, vector<1x128xf32>
    %c5 = arith.constant 5 : index
    %c0_19 = arith.constant 0 : index
    %43 = vector.load %arg7[%c5, %c0_19] : memref<16x256xf32, #tpu.memory_space<vmem>>, vector<1x128xf32>
    %cst_20 = arith.constant dense<0.000000e+00> : vector<128xf32>
    %44 = vector.multi_reduction <add>, %41, %cst_20 [0] : vector<8x128xf32> to vector<128xf32>
    %45 = vector.shape_cast %44 : vector<128xf32> to vector<1x128xf32>
    %cst_21 = arith.constant 8.000000e+00 : f32
    %46 = vector.broadcast %cst_21 : f32 to vector<1x128xf32>
    %47 = arith.divf %45, %46 : vector<1x128xf32>
    %48 = vector.broadcast %47 : vector<1x128xf32> to vector<8x128xf32>
    %49 = arith.subf %41, %48 : vector<8x128xf32>
    %50 = arith.mulf %49, %49 : vector<8x128xf32>
    %cst_22 = arith.constant dense<0.000000e+00> : vector<128xf32>
    %51 = vector.multi_reduction <add>, %50, %cst_22 [0] : vector<8x128xf32> to vector<128xf32>
    %52 = vector.shape_cast %51 : vector<128xf32> to vector<1x128xf32>
    %cst_23 = arith.constant 8.000000e+00 : f32
    %53 = vector.broadcast %cst_23 : f32 to vector<1x128xf32>
    %54 = arith.divf %52, %53 : vector<1x128xf32>
    %55 = vector.broadcast %47 : vector<1x128xf32> to vector<8x128xf32>
    %56 = arith.subf %41, %55 : vector<8x128xf32>
    %57 = vector.broadcast %42 : vector<1x128xf32> to vector<8x128xf32>
    %58 = arith.mulf %57, %56 : vector<8x128xf32>
    %cst_24 = arith.constant 9.99999974E-6 : f32
    %59 = vector.broadcast %cst_24 : f32 to vector<1x128xf32>
    %60 = arith.addf %54, %59 : vector<1x128xf32>
    %61 = math.rsqrt %60 : vector<1x128xf32>
    %62 = vector.broadcast %61 : vector<1x128xf32> to vector<8x128xf32>
    %63 = arith.mulf %58, %62 : vector<8x128xf32>
    %64 = vector.broadcast %43 : vector<1x128xf32> to vector<8x128xf32>
    %65 = arith.addf %63, %64 : vector<8x128xf32>
    %cst_25 = arith.constant 0.000000e+00 : f32
    %66 = vector.broadcast %cst_25 : f32 to vector<8x128xf32>
    %67 = arith.cmpf oge, %65, %66 : vector<8x128xf32>
    %cst_26 = arith.constant 0.00999999977 : f32
    %68 = vector.broadcast %cst_26 : f32 to vector<8x128xf32>
    %69 = arith.mulf %68, %65 : vector<8x128xf32>
    %70 = arith.select %67, %65, %69 : vector<8x128xi1>, vector<8x128xf32>
    %71 = arith.truncf %70 : vector<8x128xf32> to vector<8x128xbf16>
    %c0_27 = arith.constant 0 : index
    %c0_28 = arith.constant 0 : index
    %72 = vector.load %arg4[%c0_27, %c0_28] : memref<128x128xbf16, #tpu.memory_space<vmem>>, vector<128x128xbf16>
    %cst_29 = arith.constant dense<0.000000e+00> : vector<8x128xf32>
    %73 = tpu.matmul %71, %72, %cst_29 {dimension_numbers = #tpu.dot_dimension_numbers<[1], [0], [0], [1], [0, 0, 1, 1], [], []>} : vector<8x128xbf16>, vector<128x128xbf16>, vector<8x128xf32> -> vector<8x128xf32>
    %c6 = arith.constant 6 : index
    %c0_30 = arith.constant 0 : index
    %74 = vector.load %arg7[%c6, %c0_30] : memref<16x256xf32, #tpu.memory_space<vmem>>, vector<1x128xf32>
    %75 = vector.broadcast %74 : vector<1x128xf32> to vector<8x128xf32>
    %76 = arith.addf %73, %75 : vector<8x128xf32>
    %cst_31 = arith.constant 0.000000e+00 : f32
    %77 = vector.broadcast %cst_31 : f32 to vector<8x128xf32>
    %78 = arith.cmpf oge, %76, %77 : vector<8x128xf32>
    %cst_32 = arith.constant 0.00999999977 : f32
    %79 = vector.broadcast %cst_32 : f32 to vector<8x128xf32>
    %80 = arith.mulf %79, %76 : vector<8x128xf32>
    %81 = arith.select %78, %76, %80 : vector<8x128xi1>, vector<8x128xf32>
    %82 = arith.truncf %81 : vector<8x128xf32> to vector<8x128xbf16>
    %c0_33 = arith.constant 0 : index
    %c0_34 = arith.constant 0 : index
    %83 = vector.load %arg5[%c0_33, %c0_34] : memref<128x256xbf16, #tpu.memory_space<vmem>>, vector<128x256xbf16>
    %cst_35 = arith.constant dense<0.000000e+00> : vector<8x256xf32>
    %84 = tpu.matmul %82, %83, %cst_35 {dimension_numbers = #tpu.dot_dimension_numbers<[1], [0], [0], [1], [0, 0, 1, 1], [], []>} : vector<8x128xbf16>, vector<128x256xbf16>, vector<8x256xf32> -> vector<8x256xf32>
    %c7 = arith.constant 7 : index
    %c0_36 = arith.constant 0 : index
    %85 = vector.load %arg7[%c7, %c0_36] : memref<16x256xf32, #tpu.memory_space<vmem>>, vector<1x256xf32>
    %86 = vector.broadcast %85 : vector<1x256xf32> to vector<8x256xf32>
    %87 = arith.addf %84, %86 : vector<8x256xf32>
    %cst_37 = arith.constant 0.000000e+00 : f32
    %88 = vector.broadcast %cst_37 : f32 to vector<8x256xf32>
    %89 = arith.cmpf oge, %87, %88 : vector<8x256xf32>
    %cst_38 = arith.constant 0.00999999977 : f32
    %90 = vector.broadcast %cst_38 : f32 to vector<8x256xf32>
    %91 = arith.mulf %90, %87 : vector<8x256xf32>
    %92 = arith.select %89, %87, %91 : vector<8x256xi1>, vector<8x256xf32>
    %93 = arith.truncf %92 : vector<8x256xf32> to vector<8x256xbf16>
    %c0_39 = arith.constant 0 : index
    %c0_40 = arith.constant 0 : index
    %94 = vector.load %arg6[%c0_39, %c0_40] : memref<256x128xbf16, #tpu.memory_space<vmem>>, vector<256x128xbf16>
    %cst_41 = arith.constant dense<0.000000e+00> : vector<8x128xf32>
    %95 = tpu.matmul %93, %94, %cst_41 {dimension_numbers = #tpu.dot_dimension_numbers<[1], [0], [0], [1], [0, 0, 1, 1], [], []>} : vector<8x256xbf16>, vector<256x128xbf16>, vector<8x128xf32> -> vector<8x128xf32>
    %c8 = arith.constant 8 : index
    %c0_42 = arith.constant 0 : index
    %96 = vector.load %arg7[%c8, %c0_42] : memref<16x256xf32, #tpu.memory_space<vmem>>, vector<1x128xf32>
    %97 = vector.broadcast %96 : vector<1x128xf32> to vector<8x128xf32>
    %98 = arith.addf %95, %97 : vector<8x128xf32>
    %99 = tpu.iota {dimensions = array<i32: 1>} : vector<8x128xi32>
    %c10_i32 = arith.constant 10 : i32
    %100 = vector.broadcast %c10_i32 : i32 to vector<8x128xi32>
    %101 = arith.cmpi eq, %99, %100 : vector<8x128xi32>
    %102 = math.tanh %98 : vector<8x128xf32>
    %103 = arith.select %101, %98, %102 : vector<8x128xi1>, vector<8x128xf32>
    %c9 = arith.constant 9 : index
    %c0_43 = arith.constant 0 : index
    %104 = vector.load %arg7[%c9, %c0_43] : memref<16x256xf32, #tpu.memory_space<vmem>>, vector<1x128xf32>
    %c0_44 = arith.constant 0 : index
    %c0_45 = arith.constant 0 : index
    %105 = vector.load %arg1[%c0_44, %c0_45] : memref<8x128xf32, #tpu.memory_space<vmem>>, vector<8x128xf32>
    %106 = math.log %104 : vector<1x128xf32>
    %107 = vector.shape_cast %106 : vector<1x128xf32> to vector<1x1x128xf32>
    %cst_46 = arith.constant dense<0.000000e+00> : vector<1xf32>
    %108 = vector.multi_reduction <add>, %107, %cst_46 [1, 2] : vector<1x1x128xf32> to vector<1xf32>
    %109 = vector.shape_cast %108 : vector<1xf32> to vector<1x1x1xf32>
    %110 = vector.extract %109[0, 0, 0] : f32 from vector<1x1x1xf32>
    %111 = arith.mulf %105, %105 : vector<8x128xf32>
    %cst_47 = arith.constant dense<0.000000e+00> : vector<8xf32>
    %112 = vector.multi_reduction <add>, %111, %cst_47 [1] : vector<8x128xf32> to vector<8xf32>
    %113 = vector.shape_cast %112 : vector<8xf32> to vector<8x1xf32>
    %cst_48 = arith.constant -5.000000e-01 : f32
    %114 = vector.broadcast %cst_48 : f32 to vector<8x1xf32>
    %115 = arith.mulf %114, %113 : vector<8x1xf32>
    %116 = vector.broadcast %110 : f32 to vector<8x1xf32>
    %117 = arith.subf %115, %116 : vector<8x1xf32>
    %cst_49 = arith.constant 3.67575407 : f32
    %118 = vector.broadcast %cst_49 : f32 to vector<8x1xf32>
    %119 = arith.subf %117, %118 : vector<8x1xf32>
    %cst_50 = arith.constant 5.67575407 : f32
    %120 = arith.addf %cst_50, %110 : f32
    %121 = vector.broadcast %104 : vector<1x128xf32> to vector<8x128xf32>
    %122 = arith.mulf %121, %105 : vector<8x128xf32>
    %123 = arith.addf %103, %122 : vector<8x128xf32>
    %c8_i32 = arith.constant 8 : i32
    %124 = vector.broadcast %c8_i32 : i32 to vector<8x128xi32>
    %125 = arith.cmpi eq, %99, %124 : vector<8x128xi32>
    %cst_51 = arith.constant 0.000000e+00 : f32
    %126 = vector.shape_cast %119 : vector<8x1xf32> to vector<8x1xf32>
    %127 = vector.broadcast %126 : vector<8x1xf32> to vector<8x128xf32>
    %128 = vector.broadcast %cst_51 : f32 to vector<8x128xf32>
    %129 = arith.select %125, %127, %128 : vector<8x128xi1>, vector<8x128xf32>
    %130 = arith.addf %123, %129 : vector<8x128xf32>
    %c9_i32 = arith.constant 9 : i32
    %131 = vector.broadcast %c9_i32 : i32 to vector<8x128xi32>
    %132 = arith.cmpi eq, %99, %131 : vector<8x128xi32>
    %cst_52 = arith.constant 0.000000e+00 : f32
    %133 = vector.broadcast %120 : f32 to vector<8x128xf32>
    %134 = vector.broadcast %cst_52 : f32 to vector<8x128xf32>
    %135 = arith.select %132, %133, %134 : vector<8x128xi1>, vector<8x128xf32>
    %136 = arith.addf %130, %135 : vector<8x128xf32>
    %c0_53 = arith.constant 0 : index
    %c0_54 = arith.constant 0 : index
    %137 = vector.load %arg8[%c0_53, %c0_54] : memref<8x128xf32, #tpu.memory_space<vmem>>, vector<8x128xf32>
    tpu.vector_store %arg8[%c0_53, %c0_54], %136 {strides = array<i32>} : memref<8x128xf32, #tpu.memory_space<vmem>>, vector<8x128xf32>,
    return
  }
}

</mosaic_0001>

<bundles_post_ra>
// kernel: tpu_custom_call.1
= control target key start
LH: loop header
LB: loop body
LE: loop exit
PB: predicated region body
PF: predicated region fallthrough
CT: control target
= control target key end

     0   :  { %13 = vsyncpa [#allocation3], 0  ;;  %s1750_s0 = inlined_call_operand.hbm [shape: f32[8,128], index: 0, kind: input, shape index: {}]   ;;  %s1751_s1 = inlined_call_operand.hbm [shape: f32[8,128], index: 1, kind: input, shape index: {}]   ;;  %s1752_s2 = inlined_call_operand.hbm [shape: bf16[128,256], index: 2, kind: input, shape index: {}]   ;;  %s1753_s3 = inlined_call_operand.hbm [shape: bf16[256,128], index: 3, kind: input, shape index: {}]   ;;  %s1754_s4 = inlined_call_operand.hbm [shape: bf16[128,128], index: 4, kind: input, shape index: {}]   ;;  %s1755_s5 = inlined_call_operand.hbm [shape: bf16[128,256], index: 5, kind: input, shape index: {}]   ;;  %s1756_s6 = inlined_call_operand.hbm [shape: bf16[256,128], index: 6, kind: input, shape index: {}]   ;;  %s1757_s7 = inlined_call_operand.hbm [shape: f32[16,256], index: 7, kind: input, shape index: {}]   ;;  %s1758_s8 = inlined_call_operand.hbm [shape: f32[8,128], index: 8, kind: output, shape index: {}]  }
   0x1   :  { %14 = vsyncpa [#allocation6], 0 }
   0x2   :  { %15 = vsyncpa [#allocation9], 0 }
   0x3   :  { %16 = vsyncpa [#allocation12], 0 }
   0x4   :  { %17 = vsyncpa [#allocation15], 0 }
   0x5   :  { %18 = vsyncpa [#allocation4], 0  ;;  %s1527_s27 = smov [#allocation5]   ;;  %s1528_s29 = smov [#allocation8]  }
   0x6   :  { %s35_s28 = sshll.u32 %s1527_s27, 4  ;;  %s56_s30 = sshll.u32 %s1528_s29, 4  ;;  %s36_s28 = int_to_ptr.vmem [resolvable:$true] %s35_s28  ;;  %s1590_s30 = int_to_ptr.vmem [resolvable:$true] %s56_s30 }
   0x7   :  { %s1317_s11 = scalar_lea.hbm %s1751_s1, 128 }
   0x8   :  { %p1318_p0 = scmp.ne.s32.totalorder %s1751_s1, %s1317_s11  ;;  %p1321_p1 = scmp.lt.u32.totalorder %s1317_s11, %s1751_s1 }
   0xa   :  { %p1323_p2 = pnand %p1321_p1, %p1318_p0 }
   0xc   :  { %1326 = shalt.err (!%p1323_p2)
}
   0xd   :  { %s1327_s16 = scalar_lea.vmem %s36_s28, 128  ;;  %p1332_p4 = scmp.lt.s32.totalorder %s36_s28, %s36_s28 }
   0xe   :  { %p1328_p3 = scmp.ne.s32.totalorder %s36_s28, %s1327_s16  ;;  %p1333_p5 = scmp.lt.s32.totalorder %s1327_s16, %s1327_s16 }
  0x10   :  { %p1334_p6 = por %p1333_p5, %p1332_p4 }
  0x12   :  { %p1335_p7 = pnand %p1334_p6, %p1328_p3 }
  0x14   :  { %1338 = shalt.err (!%p1335_p7)
}
  0x15   :  { %38 = dma.hbm_to_vmem [thread:$0]  %s1751_s1, 128, %s36_s28, [#allocation6]  }
  0x16   :  { %s1339_s21 = scalar_lea.hbm %s1753_s3, 2048 }
  0x17   :  { %p1340_p8 = scmp.ne.s32.totalorder %s1753_s3, %s1339_s21  ;;  %p1343_p9 = scmp.lt.u32.totalorder %s1339_s21, %s1753_s3 }
  0x19   :  { %p1345_p10 = pnand %p1343_p9, %p1340_p8 }
  0x1b   :  { %1348 = shalt.err (!%p1345_p10)
}
  0x1c   :  { %s1349_s26 = scalar_lea.vmem %s1590_s30, 2048  ;;  %p1354_p12 = scmp.lt.s32.totalorder %s1590_s30, %s1590_s30 }
  0x1d   :  { %p1350_p11 = scmp.ne.s32.totalorder %s1590_s30, %s1349_s26  ;;  %p1355_p13 = scmp.lt.s32.totalorder %s1349_s26, %s1349_s26 }
  0x1f   :  { %p1356_p0 = por %p1355_p13, %p1354_p12 }
  0x21   :  { %p1357_p1 = pnand %p1356_p0, %p1350_p11 }
  0x23   :  { %1360 = shalt.err (!%p1357_p1)
}
  0x24   :  { %s1529_s1 = smov 64   ;;  %s1530_s27 = smov 4  }
  0x25   :  { %62 = dma.hbm_to_vmem [thread:$0]  %s1753_s3, 2048, %s1590_s30, [#allocation9], %s1529_s1, %s1529_s1, %s1530_s27  }
  0x26   :  { %s1531_s9 = smov [#allocation11]   ;;  %s1532_s11 = smov [#allocation2]  }
  0x27   :  { %s80_s10 = sshll.u32 %s1531_s9, 4  ;;  %s25_s12 = sshll.u32 %s1532_s11, 4  ;;  %s81_s10 = int_to_ptr.vmem [resolvable:$true] %s80_s10  ;;  %s26_s12 = int_to_ptr.vmem [resolvable:$true] %s25_s12 }
  0x28   :  { %s1361_s15 = scalar_lea.hbm %s1755_s5, 2048 }
  0x29   :  { %p1362_p2 = scmp.ne.s32.totalorder %s1755_s5, %s1361_s15  ;;  %p1365_p3 = scmp.lt.u32.totalorder %s1361_s15, %s1755_s5 }
  0x2b   :  { %p1367_p4 = pnand %p1365_p3, %p1362_p2 }
  0x2d   :  { %1370 = shalt.err (!%p1367_p4)
}
  0x2e   :  { %s1371_s3 = scalar_lea.vmem %s81_s10, 2048  ;;  %p1376_p6 = scmp.lt.s32.totalorder %s81_s10, %s81_s10 }
  0x2f   :  { %p1372_p5 = scmp.ne.s32.totalorder %s81_s10, %s1371_s3  ;;  %p1377_p7 = scmp.lt.s32.totalorder %s1371_s3, %s1371_s3 }
  0x31   :  { %p1378_p8 = por %p1377_p7, %p1376_p6 }
  0x33   :  { %p1379_p9 = pnand %p1378_p8, %p1372_p5 }
  0x35   :  { %1382 = shalt.err (!%p1379_p9)
}
  0x36   :  { %s1533_s30 = smov 128   ;;  %s1534_s20 = smov 8  }
  0x37   :  { %86 = dma.hbm_to_vmem [thread:$0]  %s1755_s5, 2048, %s81_s10, [#allocation12], %s1533_s30, %s1533_s30, %s1534_s20  }
  0x38   :  { %s1383_s25 = scalar_lea.hbm %s1750_s0, 128 }
  0x39   :  { %p1384_p10 = scmp.ne.s32.totalorder %s1750_s0, %s1383_s25  ;;  %p1387_p11 = scmp.lt.u32.totalorder %s1383_s25, %s1750_s0 }
  0x3b   :  { %p1389_p12 = pnand %p1387_p11, %p1384_p10 }
  0x3d   :  { %1392 = shalt.err (!%p1389_p12)
}
  0x3e   :  { %s1393_s11 = scalar_lea.vmem %s26_s12, 128  ;;  %p1398_p0 = scmp.lt.s32.totalorder %s26_s12, %s26_s12 }
  0x3f   :  { %p1394_p13 = scmp.ne.s32.totalorder %s26_s12, %s1393_s11  ;;  %p1399_p1 = scmp.lt.s32.totalorder %s1393_s11, %s1393_s11 }
  0x41   :  { %p1400_p2 = por %p1399_p1, %p1398_p0 }
  0x43   :  { %p1401_p3 = pnand %p1400_p2, %p1394_p13 }
  0x45   :  { %1404 = shalt.err (!%p1401_p3)
}
  0x46   :  { %28 = dma.hbm_to_vmem [thread:$0]  %s1750_s0, 128, %s26_s12, [#allocation3]  }
  0x47   :  { %s1535_s13 = smov [#allocation7]   ;;  %s1536_s15 = smov [#allocation10]  }
  0x48   :  { %s44_s14 = sshll.u32 %s1535_s13, 4  ;;  %s68_s16 = sshll.u32 %s1536_s15, 4  ;;  %s45_s14 = int_to_ptr.vmem [resolvable:$true] %s44_s14  ;;  %s1651_s16 = int_to_ptr.vmem [resolvable:$true] %s68_s16 }
  0x49   :  { %s1405_s19 = scalar_lea.hbm %s1752_s2, 2048 }
  0x4a   :  { %p1406_p4 = scmp.ne.s32.totalorder %s1752_s2, %s1405_s19  ;;  %p1409_p5 = scmp.lt.u32.totalorder %s1405_s19, %s1752_s2 }
  0x4c   :  { %p1411_p6 = pnand %p1409_p5, %p1406_p4 }
  0x4e   :  { %1414 = shalt.err (!%p1411_p6)
}
  0x4f   :  { %s1415_s0 = scalar_lea.vmem %s45_s14, 2048  ;;  %p1420_p8 = scmp.lt.s32.totalorder %s45_s14, %s45_s14 }
  0x50   :  { %p1416_p7 = scmp.ne.s32.totalorder %s45_s14, %s1415_s0  ;;  %p1421_p9 = scmp.lt.s32.totalorder %s1415_s0, %s1415_s0 }
  0x52   :  { %p1422_p10 = por %p1421_p9, %p1420_p8 }
  0x54   :  { %p1423_p11 = pnand %p1422_p10, %p1416_p7 }
  0x56   :  { %1426 = shalt.err (!%p1423_p11)
}
  0x57   :  { %50 = dma.hbm_to_vmem [thread:$0]  %s1752_s2, 2048, %s45_s14, [#allocation6], %s1533_s30, %s1533_s30, %s1534_s20  }
  0x58   :  { %s1427_s28 = scalar_lea.hbm %s1754_s4, 1024 }
  0x59   :  { %p1428_p12 = scmp.ne.s32.totalorder %s1754_s4, %s1427_s28  ;;  %p1431_p13 = scmp.lt.u32.totalorder %s1427_s28, %s1754_s4 }
  0x5b   :  { %p1433_p0 = pnand %p1431_p13, %p1428_p12 }
  0x5d   :  { %1436 = shalt.err (!%p1433_p0)
}
  0x5e   :  { %s1437_s10 = scalar_lea.vmem %s1651_s16, 1024  ;;  %p1442_p2 = scmp.lt.s32.totalorder %s1651_s16, %s1651_s16 }
  0x5f   :  { %p1438_p1 = scmp.ne.s32.totalorder %s1651_s16, %s1437_s10  ;;  %p1443_p3 = scmp.lt.s32.totalorder %s1437_s10, %s1437_s10 }
  0x61   :  { %p1444_p4 = por %p1443_p3, %p1442_p2 }
  0x63   :  { %p1445_p5 = pnand %p1444_p4, %p1438_p1 }
  0x65   :  { %1448 = shalt.err (!%p1445_p5)
}
  0x66   :  { %74 = dma.hbm_to_vmem [thread:$0]  %s1754_s4, 1024, %s1651_s16, [#allocation9], %s1529_s1, %s1529_s1, %s1530_s27  }
  0x67   :  { %s1537_s20 = smov [#allocation13]   ;;  %s1538_s14 = smov [#allocation14]  }
  0x68   :  { %s92_s13 = sshll.u32 %s1537_s20, 4  ;;  %s104_s15 = sshll.u32 %s1538_s14, 4  ;;  %s93_s13 = int_to_ptr.vmem [resolvable:$true] %s92_s13  ;;  %s1688_s15 = int_to_ptr.vmem [resolvable:$true] %s104_s15 }
  0x69   :  { %s1449_s19 = scalar_lea.hbm %s1756_s6, 2048 }
  0x6a   :  { %p1450_p6 = scmp.ne.s32.totalorder %s1756_s6, %s1449_s19  ;;  %p1453_p7 = scmp.lt.u32.totalorder %s1449_s19, %s1756_s6 }
  0x6c   :  { %p1455_p8 = pnand %p1453_p7, %p1450_p6 }
  0x6e   :  { %1458 = shalt.err (!%p1455_p8)
}
  0x6f   :  { %s1459_s4 = scalar_lea.vmem %s93_s13, 2048  ;;  %p1464_p10 = scmp.lt.s32.totalorder %s93_s13, %s93_s13 }
  0x70   :  { %p1460_p9 = scmp.ne.s32.totalorder %s93_s13, %s1459_s4  ;;  %p1465_p11 = scmp.lt.s32.totalorder %s1459_s4, %s1459_s4 }
  0x72   :  { %p1466_p12 = por %p1465_p11, %p1464_p10 }
  0x74   :  { %p1467_p13 = pnand %p1466_p12, %p1460_p9 }
  0x76   :  { %1470 = shalt.err (!%p1467_p13)
}
  0x77   :  { %98 = dma.hbm_to_vmem [thread:$0]  %s1756_s6, 2048, %s93_s13, [#allocation12], %s1529_s1, %s1529_s1, %s1530_s27  }
  0x78   :  { %s1471_s25 = scalar_lea.hbm %s1757_s7, 512 }
  0x79   :  { %p1472_p0 = scmp.ne.s32.totalorder %s1757_s7, %s1471_s25  ;;  %p1475_p1 = scmp.lt.u32.totalorder %s1471_s25, %s1757_s7 }
  0x7b   :  { %p1477_p2 = pnand %p1475_p1, %p1472_p0 }
  0x7d   :  { %1480 = shalt.err (!%p1477_p2)
}
  0x7e   :  { %s1481_s11 = scalar_lea.vmem %s1688_s15, 512  ;;  %p1486_p4 = scmp.lt.s32.totalorder %s1688_s15, %s1688_s15 }
  0x7f   :  { %p1482_p3 = scmp.ne.s32.totalorder %s1688_s15, %s1481_s11  ;;  %p1487_p5 = scmp.lt.s32.totalorder %s1481_s11, %s1481_s11 }
  0x81   :  { %p1488_p6 = por %p1487_p5, %p1486_p4 }
  0x83   :  { %p1489_p7 = pnand %p1488_p6, %p1482_p3 }
  0x85   :  { %1492 = shalt.err (!%p1489_p7)
}
  0x86   :  { %s1539_s6 = smov 256   ;;  %s1540_s1 = smov 16  }
  0x87   :  { %110 = dma.hbm_to_vmem [thread:$0]  %s1757_s7, 512, %s1688_s15, [#allocation15], %s1539_s6, %s1539_s6, %s1540_s1  }
  0x88   :  { %1515 = dma.done.wait [#allocation3], 128  }
  0x89   :  { %1516 = vsyncadd [#allocation3], 4294967168 }
  0x8a   :  { %1517 = dma.done.wait [#allocation6], 2176  }
  0x8b   :  { %1518 = vsyncadd [#allocation6], 4294965120 }
  0x8c   :  { %1519 = dma.done.wait [#allocation9], 3072  }
  0x8d   :  { %1520 = vsyncadd [#allocation9], 4294964224 }
  0x8e   :  { %1521 = dma.done.wait [#allocation12], 4096  }
  0x8f   :  { %1522 = vsyncadd [#allocation12], 4294963200 }
  0x90   :  { %1523 = dma.done.wait [#allocation15], 512  }
  0x91   :  { %1524 = vsyncadd [#allocation15], 4294966784  ;;  %v1541_v0 = vmov 0   ;;  %v1219_v1 = vld [vmem:[#allocation7 + $0x4] ss:$8 sps:$4 sm:$0xff]   ;;  %v136_v17 = vld [vmem:[#allocation2] sm:$0xff]  ;;  %v156_v35 = vlaneseq }
  0x92   :  { %278 = vmatprep.mubr.bf16.mxu0 %v1541_v0  ;;  %v1221_v2 = vld [vmem:[#allocation7] ss:$8 sps:$4 sm:$0xff]   ;;  %246 = vmatprep.subr.bf16.mxu0 %v1219_v1  ;;  %v1222_v3 = vld [vmem:[#allocation7 + $0x14] ss:$8 sps:$4 sm:$0xff]   ;;  %v1224_v4 = vld [vmem:[#allocation7 + $0x10] ss:$8 sps:$4 sm:$0xff]   ;;  %v137_v18 = vpack.c.bf16 %v136_v17, %v136_v17 }
  0x93   :  { %247 = vmatpush1.bf16.msra.mxu0 %v1221_v2  ;;  %v1225_v5 = vld [vmem:[#allocation7 + $0x24] ss:$8 sps:$4 sm:$0xff]   ;;  %v1227_v6 = vld [vmem:[#allocation7 + $0x20] ss:$8 sps:$4 sm:$0xff]   ;;  %v1228_v7 = vld [vmem:[#allocation7 + $0x34] ss:$8 sps:$4 sm:$0xff]  }
  0x94   :  { %248 = vmatprep.subr.bf16.mxu0 %v1222_v3  ;;  %v1230_v8 = vld [vmem:[#allocation7 + $0x30] ss:$8 sps:$4 sm:$0xff]   ;;  %v1231_v9 = vld [vmem:[#allocation7 + $0x44] ss:$8 sps:$4 sm:$0xff]   ;;  %v1233_v10 = vld [vmem:[#allocation7 + $0x40] ss:$8 sps:$4 sm:$0xff]  }
  0x95   :  { %v1234_v11 = vld [vmem:[#allocation7 + $0x54] ss:$8 sps:$4 sm:$0xff]   ;;  %v1236_v12 = vld [vmem:[#allocation7 + $0x50] ss:$8 sps:$4 sm:$0xff]   ;;  %v1237_v13 = vld [vmem:[#allocation7 + $0x64] ss:$8 sps:$4 sm:$0xff]  }
  0x96   :  { %v1239_v14 = vld [vmem:[#allocation7 + $0x60] ss:$8 sps:$4 sm:$0xff]   ;;  %v1240_v15 = vld [vmem:[#allocation7 + $0x74] ss:$8 sps:$4 sm:$0xff]   ;;  %v1242_v16 = vld [vmem:[#allocation7 + $0x70] ss:$8 sps:$4 sm:$0xff]  }
  0x97   :  { %249 = vmatpush1.bf16.msra.mxu0 %v1224_v4  ;;  %v1243_v19 = vld [vmem:[#allocation8 + $0x40] sm:$0xff]   ;;  %v1245_v21 = vld [vmem:[#allocation8 + $0x48] sm:$0xff]   ;;  %v1247_v23 = vld [vmem:[#allocation8 + $0x50] sm:$0xff]   ;;  %v157_v36 = vshrl.u32 %v156_v35, 7  ;;  %vm1543_vm2 = vmmov 0   ;;  %vm1005_vm5 = vcmask 1040384  }
  0x98   :  { %250 = vmatprep.subr.bf16.mxu0 %v1225_v5  ;;  %v1244_v20 = vld [vmem:[#allocation8] sm:$0xff]   ;;  %1126 = vmatprep.subr.bf16.mxu1 %v1243_v19  ;;  %v1246_v22 = vld [vmem:[#allocation8 + $0x8] sm:$0xff]   ;;  %v1248_v24 = vld [vmem:[#allocation8 + $0x10] sm:$0xff]   ;;  %s1544_s2 = smov [#allocation16]  }
  0x99   :  { %1127 = vmatpush3.bf16.msra.mxu1 %v1244_v20  ;;  %v1249_v25 = vld [vmem:[#allocation8 + $0x58] sm:$0xff]   ;;  %v1251_v27 = vld [vmem:[#allocation8 + $0x60] sm:$0xff]   ;;  %v1253_v29 = vld [vmem:[#allocation8 + $0x68] sm:$0xff]   ;;  %v1724_v37 = vsub.s32 0, %v157_v36  ;;  %v1726_v39 = vsub.s32 1, %v157_v36  ;;  %s1040_s30 = sshll.u32 %s1544_s2, 4  ;;  %s1041_s30 = int_to_ptr.vmem [resolvable:$true] %s1040_s30 }
  0x9a   :  { %1128 = vmatprep.subr.bf16.mxu1 %v1245_v21  ;;  %v1250_v26 = vld [vmem:[#allocation8 + $0x18] sm:$0xff]   ;;  %v1252_v28 = vld [vmem:[#allocation8 + $0x20] sm:$0xff]   ;;  %v1254_v30 = vld [vmem:[#allocation8 + $0x28] sm:$0xff]   ;;  %s1493_s20 = scalar_lea.vmem %s1041_s30, 128  ;;  %p1498_p9 = scmp.lt.s32.totalorder %s1041_s30, %s1041_s30 }
  0x9b   :  { %251 = vmatpush1.bf16.msra.mxu0 %v1227_v6  ;;  %v1255_v31 = vld [vmem:[#allocation8 + $0x70] sm:$0xff]   ;;  %v1257_v33 = vld [vmem:[#allocation8 + $0x78] sm:$0xff]   ;;  %v154_v38 = vld [vmem:[#allocation14] ss:$8 sm:$0x3]  ;;  %p1494_p8 = scmp.ne.s32.totalorder %s1041_s30, %s1493_s20  ;;  %p1499_p10 = scmp.lt.s32.totalorder %s1493_s20, %s1493_s20 }
  0x9c   :  { %252 = vmatprep.subr.bf16.mxu0 %v1228_v7  ;;  %v1256_v32 = vld [vmem:[#allocation8 + $0x30] sm:$0xff]   ;;  %v1258_v34 = vld [vmem:[#allocation8 + $0x38] sm:$0xff]   ;;  %v159_v40 = vrot.slane %v154_v38, %v1724_v37  ;;  %v163_v41 = vrot.slane %v154_v38, %v1726_v39  ;;  %v288_v19 = vld [vmem:[#allocation14 + $0x1] ss:$8 sm:$0x3] }
  0x9d   :  { %1129 = vmatpush3.bf16.msra.mxu1 %v1246_v22  ;;  %v328_v20 = vrot.slane %v288_v19, %v1724_v37  ;;  %v332_v21 = vrot.slane %v288_v19, %v1726_v39  ;;  %v290_v22 = vld [vmem:[#allocation14 + $0x2] ss:$8 sm:$0x3]  ;;  %p1500_p11 = por %p1499_p10, %p1498_p9 }
  0x9e   :  { %1130 = vmatprep.subr.bf16.mxu1 %v1247_v23 }
  0x9f   :  { %253 = vmatpush1.bf16.msra.mxu0 %v1230_v8  ;;  %p1501_p12 = pnand %p1500_p11, %p1494_p8 }
  0xa0   :  { %254 = vmatprep.subr.bf16.mxu0 %v1231_v9 }
  0xa1   :  { %1131 = vmatpush3.bf16.msra.mxu1 %v1248_v24  ;;  %v347_v24 = vrot.slane %v290_v22, %v1724_v37 }
  0xa2   :  { %1132 = vmatprep.subr.bf16.mxu1 %v1249_v25 }
  0xa3   :  { %255 = vmatpush1.bf16.msra.mxu0 %v1233_v10 }
  0xa4   :  { %256 = vmatprep.subr.bf16.mxu0 %v1234_v11 }
  0xa5   :  { %1133 = vmatpush3.bf16.msra.mxu1 %v1250_v26 }
  0xa6   :  { %1134 = vmatprep.subr.bf16.mxu1 %v1251_v27  ;;  %v351_v27 = vrot.slane %v290_v22, %v1726_v39 }
  0xa7   :  { %257 = vmatpush1.bf16.msra.mxu0 %v1236_v12 }
  0xa8   :  { %258 = vmatprep.subr.bf16.mxu0 %v1237_v13 }
  0xa9   :  { %1135 = vmatpush3.bf16.msra.mxu1 %v1252_v28 }
  0xaa   :  { %1136 = vmatprep.subr.bf16.mxu1 %v1253_v29 }
  0xab   :  { %259 = vmatpush1.bf16.msra.mxu0 %v1239_v14 }
  0xac   :  { %260 = vmatprep.subr.bf16.mxu0 %v1240_v15 }
  0xad   :  { %1137 = vmatpush3.bf16.msra.mxu1 %v1254_v30 }
  0xae   :  { %1138 = vmatprep.subr.bf16.mxu1 %v1255_v31 }
  0xaf   :  { %261 = vmatpush1.bf16.msra.mxu0 %v1242_v16 }
  0xb1   :  { %1139 = vmatpush3.bf16.msra.mxu1 %v1256_v32 }
  0xb2   :  { %279 = vmatmul.mubr.bf16.vlgmr.msra.gmra.mrb[0].mxu0 %v137_v18  ;;  %1140 = vmatprep.subr.bf16.mxu1 %v1257_v33 }
  0xb5   :  { %1141 = vmatpush3.bf16.msra.mxu1 %v1258_v34 }
 0x185   :  { %v280_v42 = vpop.f32.mrb[0].mxu0 }
 0x186   :  { %v281_v43 = vadd.f32 %v280_v42, %v159_v40  ;;  %v282_v44 = vpop.f32.mrb[1].mxu0  ;;  %v1259_v42 = vld [vmem:[#allocation10] sm:$0xff]  }
 0x187   :  { %v283_v45 = vadd.f32 %v282_v44, %v163_v41  ;;  %v284_v46 = vpop.f32.mrb[2].mxu0  ;;  %v1260_v44 = vld [vmem:[#allocation10 + $0x8] sm:$0xff]  }
 0x188   :  { %v291_v47 = vrot.slane %v281_v43, 4  ;;  %v285_v48 = vpop.f32.mrb[3].mxu0  ;;  %v1262_v46 = vld [vmem:[#allocation10 + $0x18] sm:$0xff]  }
 0x189   :  { %v297_v49 = vrot.slane %v283_v45, 4  ;;  %v1264_v48 = vld [vmem:[#allocation10 + $0x28] sm:$0xff]  }
 0x18a   :  { %v292_v50 = vadd.f32 %v291_v47, %v281_v43  ;;  %v1263_v47 = vld [vmem:[#allocation10 + $0x20] sm:$0xff]  }
 0x18b   :  { %v298_v51 = vadd.f32 %v297_v49, %v283_v45  ;;  %v1266_v49 = vld [vmem:[#allocation10 + $0x38] sm:$0xff]  }
 0x18c   :  { %v293_v52 = vrot.slane %v292_v50, 2 }
 0x18d   :  { %v299_v53 = vrot.slane %v298_v51, 2 }
 0x18e   :  { %v294_v54 = vadd.f32 %v293_v52, %v292_v50  ;;  %v1267_v50 = vld [vmem:[#allocation11] ss:$8 sps:$4 sm:$0xff]   ;;  %v1272_v52 = vld [vmem:[#allocation11 + $0x14] ss:$8 sps:$4 sm:$0xff]  }
 0x18f   :  { %v300_v55 = vadd.f32 %v299_v53, %v298_v51  ;;  %v1269_v51 = vld [vmem:[#allocation11 + $0x4] ss:$8 sps:$4 sm:$0xff]   ;;  %v1270_v53 = vld [vmem:[#allocation11 + $0x10] ss:$8 sps:$4 sm:$0xff]  }
 0x190   :  { %v295_v56 = vrot.slane %v294_v54, 1  ;;  %778 = vmatprep.subr.bf16.mxu1 %v1269_v51 }
 0x191   :  { %v301_v57 = vrot.slane %v300_v55, 1 }
 0x192   :  { %v296_v58 = vadd.f32 %v295_v56, %v294_v54  ;;  %v1275_v54 = vld [vmem:[#allocation11 + $0x24] ss:$8 sps:$4 sm:$0xff]   ;;  %v1278_v56 = vld [vmem:[#allocation11 + $0x34] ss:$8 sps:$4 sm:$0xff]  }
 0x193   :  { %v302_v59 = vadd.f32 %v301_v57, %v300_v55  ;;  %v1273_v55 = vld [vmem:[#allocation11 + $0x20] ss:$8 sps:$4 sm:$0xff]   ;;  %v1276_v57 = vld [vmem:[#allocation11 + $0x30] ss:$8 sps:$4 sm:$0xff]  }
 0x194   :  { %v304_v60 = vmul.f32 0.125, %v296_v58  ;;  %v1281_v58 = vld [vmem:[#allocation11 + $0x44] ss:$8 sps:$4 sm:$0xff]  }
 0x195   :  { %v305_v61 = vmul.f32 0.125, %v302_v59  ;;  %v1279_v59 = vld [vmem:[#allocation11 + $0x40] ss:$8 sps:$4 sm:$0xff]  }
 0x196   :  { %v306_v62 = vsub.f32 %v281_v43, %v304_v60  ;;  %v1542_v43 = vmov 0.0   ;;  %v1284_v60 = vld [vmem:[#allocation11 + $0x54] ss:$8 sps:$4 sm:$0xff]  }
 0x197   :  { %v307_v63 = vsub.f32 %v283_v45, %v305_v61  ;;  %1179 = vmatprep.subr.bf16.mxu0 %v1542_v43  ;;  %v1261_v45 = vld [vmem:[#allocation10 + $0x10] sm:$0xff]   ;;  %1195 = vmatprep.mubr.msk.bf16.mxu0 %vm1543_vm2, %v1542_v43 }
 0x198   :  { %v308_v1 = vmul.f32 %v306_v62, %v306_v62  ;;  %v335_v23 = vmul.f32 %v328_v20, %v306_v62  ;;  %1180 = vmatpush3.bf16.msra.mxu0 %v1259_v42  ;;  %v1282_v61 = vld [vmem:[#allocation11 + $0x50] ss:$8 sps:$4 sm:$0xff]   ;;  %v1294_v42 = vld [vmem:[#allocation13 + $0x8] sm:$0xff]  }
 0x199   :  { %v309_v2 = vmul.f32 %v307_v63, %v307_v63  ;;  %v336_v26 = vmul.f32 %v332_v21, %v307_v63  ;;  %1181 = vmatprep.subr.bf16.mxu0 %v1542_v43  ;;  %v396_v63 = vld [vmem:[#allocation14 + $0x3] ss:$0 sm:$0xff] }
 0x19a   :  { %v310_v3 = vrot.slane %v308_v1, 4 }
 0x19b   :  { %v316_v4 = vrot.slane %v309_v2, 4 }
 0x19c   :  { %v311_v5 = vadd.f32 %v310_v3, %v308_v1  ;;  %1182 = vmatpush3.bf16.msra.mxu0 %v1260_v44  ;;  %v1296_v44 = vld [vmem:[#allocation13 + $0x10] sm:$0xff]  }
 0x19d   :  { %v317_v6 = vadd.f32 %v316_v4, %v309_v2  ;;  %1183 = vmatprep.subr.bf16.mxu0 %v1542_v43 }
 0x19e   :  { %v312_v7 = vrot.slane %v311_v5, 2 }
 0x19f   :  { %v318_v8 = vrot.slane %v317_v6, 2 }
 0x1a0   :  { %v313_v9 = vadd.f32 %v312_v7, %v311_v5  ;;  %1184 = vmatpush3.bf16.msra.mxu0 %v1261_v45  ;;  %v1297_v45 = vld [vmem:[#allocation13 + $0x58] sm:$0xff]  }
 0x1a1   :  { %v319_v10 = vadd.f32 %v318_v8, %v317_v6  ;;  %1185 = vmatprep.subr.bf16.mxu0 %v1542_v43 }
 0x1a2   :  { %v314_v11 = vrot.slane %v313_v9, 1 }
 0x1a3   :  { %v320_v12 = vrot.slane %v319_v10, 1 }
 0x1a4   :  { %v315_v13 = vadd.f32 %v314_v11, %v313_v9  ;;  %1186 = vmatpush3.bf16.msra.mxu0 %v1262_v46  ;;  %v1298_v46 = vld [vmem:[#allocation13 + $0x18] sm:$0xff]  }
 0x1a5   :  { %v321_v14 = vadd.f32 %v320_v12, %v319_v10  ;;  %1187 = vmatprep.subr.bf16.mxu0 %v1542_v43 }
 0x1a6   :  { %v322_v15 = vmul.f32 0.125, %v315_v13 }
 0x1a7   :  { %v323_v16 = vmul.f32 0.125, %v321_v14 }
 0x1a8   :  { %v337_v17 = vadd.f32 1e-05, %v322_v15  ;;  %1188 = vmatpush3.bf16.msra.mxu0 %v1263_v47  ;;  %v1299_v47 = vld [vmem:[#allocation13 + $0x60] sm:$0xff]  }
 0x1a9   :  { %v338_v18 = vadd.f32 1e-05, %v323_v16  ;;  %1189 = vmatprep.subr.bf16.mxu0 %v1542_v43 }
 0x1aa   :  { %1307 = vrsqrt.f32 %v337_v17 }
 0x1ab   :  { %1309 = vrsqrt.f32 %v338_v18 }
 0x1ac   :  { %1190 = vmatpush3.bf16.msra.mxu0 %v1264_v48  ;;  %v1300_v48 = vld [vmem:[#allocation13 + $0x20] sm:$0xff]  }
 0x1ad   :  { %1191 = vmatprep.subr.bf16.mxu0 %v1542_v43 }
 0x1b4   :  { %v1308_v25 = vpop.eup %1307 }
 0x1b5   :  { %v1310_v28 = vpop.eup %1309  ;;  %v341_v29 = vmul.f32 %v1308_v25, %v335_v23  ;;  %v533_v23 = vld [vmem:[#allocation14 + $0x4] ss:$0 sm:$0xff] }
 0x1b6   :  { %v342_v30 = vmul.f32 %v1310_v28, %v336_v26  ;;  %v534_v26 = vld [vmem:[#allocation14 + $0x5] ss:$0 sm:$0xff] }
 0x1b7   :  { %v354_v31 = vadd.f32 %v347_v24, %v341_v29 }
 0x1b8   :  { %v355_v32 = vadd.f32 %v351_v27, %v342_v30 }
 0x1b9   :  { %vm356_vm0 = vcmp.ge.f32.partialorder %v354_v31, 0.0  ;;  %v358_v33 = vmul.f32 0.01, %v354_v31 }
 0x1ba   :  { %vm357_vm1 = vcmp.ge.f32.partialorder %v355_v32, 0.0  ;;  %v359_v34 = vmul.f32 0.01, %v355_v32 }
 0x1bb   :  { %v360_v36 = vsel %vm356_vm0, %v354_v31, %v358_v33  ;;  %v1285_v33 = vld [vmem:[#allocation11 + $0x60] ss:$8 sps:$4 sm:$0xff]  }
 0x1bc   :  { %v361_v38 = vsel %vm357_vm1, %v355_v32, %v359_v34  ;;  %v362_v41 = vpack.c.bf16 %v360_v36, %v360_v36  ;;  %v1287_v32 = vld [vmem:[#allocation11 + $0x64] ss:$8 sps:$4 sm:$0xff]   ;;  %v1290_v34 = vld [vmem:[#allocation11 + $0x74] ss:$8 sps:$4 sm:$0xff]   ;;  %v1288_v36 = vld [vmem:[#allocation11 + $0x70] ss:$8 sps:$4 sm:$0xff]  }
 0x1bd   :  { %v363_v40 = vpack.c.bf16 %v361_v38, %v361_v38  ;;  %v1291_v38 = vld [vmem:[#allocation13 + $0x40] sm:$0xff]  }
 0x1bf   :  { %525 = vmatprep.mubr.bf16.mxu1 %v363_v40  ;;  %v1292_v40 = vld [vmem:[#allocation13] sm:$0xff]  }
 0x1c0   :  { %526 = vmatmul.mubr.bf16.vlgmr.msra.gmra.mrb[0].mxu1 %v362_v41  ;;  %v1293_v41 = vld [vmem:[#allocation13 + $0x48] sm:$0xff]  }
 0x1c1   :  { %810 = vmatprep.mubr.bf16.mxu1 %v1541_v0  ;;  %v1265_v0 = vld [vmem:[#allocation10 + $0x30] sm:$0xff]   ;;  %779 = vmatpush1.bf16.msra.mxu1 %v1267_v50  ;;  %v576_v50 = vld [vmem:[#allocation14 + $0x6] ss:$0 sm:$0xff] }
 0x1c2   :  { %1192 = vmatpush3.bf16.msra.mxu0 %v1265_v0  ;;  %780 = vmatprep.subr.bf16.mxu1 %v1272_v52  ;;  %v1301_v0 = vld [vmem:[#allocation13 + $0x68] sm:$0xff]  }
 0x1c3   :  { %1193 = vmatprep.subr.bf16.mxu0 %v1542_v43  ;;  %v1295_v43 = vld [vmem:[#allocation13 + $0x50] sm:$0xff]  }
 0x1c5   :  { %781 = vmatpush1.bf16.msra.mxu1 %v1270_v53 }
 0x1c6   :  { %1194 = vmatpush3.bf16.msra.mxu0 %v1266_v49  ;;  %782 = vmatprep.subr.bf16.mxu1 %v1275_v54  ;;  %v1302_v49 = vld [vmem:[#allocation13 + $0x28] sm:$0xff]  }
 0x1c7   :  { %1157 = vmatprep.subr.bf16.mxu0 %v1291_v38 }
 0x1c9   :  { %783 = vmatpush1.bf16.msra.mxu1 %v1273_v55 }
 0x1ca   :  { %784 = vmatprep.subr.bf16.mxu1 %v1278_v56 }
 0x1cd   :  { %785 = vmatpush1.bf16.msra.mxu1 %v1276_v57 }
 0x1ce   :  { %786 = vmatprep.subr.bf16.mxu1 %v1281_v58 }
 0x1d1   :  { %787 = vmatpush1.bf16.msra.mxu1 %v1279_v59  ;;  %v1303_v59 = vld [vmem:[#allocation13 + $0x70] sm:$0xff]  }
 0x1d2   :  { %788 = vmatprep.subr.bf16.mxu1 %v1284_v60  ;;  %v1304_v60 = vld [vmem:[#allocation13 + $0x30] sm:$0xff]  }
 0x1d5   :  { %789 = vmatpush1.bf16.msra.mxu1 %v1282_v61  ;;  %v1305_v61 = vld [vmem:[#allocation13 + $0x78] sm:$0xff]  }
 0x1d6   :  { %790 = vmatprep.subr.bf16.mxu1 %v1287_v32 }
 0x1d9   :  { %791 = vmatpush1.bf16.msra.mxu1 %v1285_v33 }
 0x1da   :  { %792 = vmatprep.subr.bf16.mxu1 %v1290_v34 }
 0x1dd   :  { %793 = vmatpush1.bf16.msra.mxu1 %v1288_v36 }
 0x293   :  { %v1142_v62 = vpop.f32.mrb[0].mxu1 }
 0x294   :  { %v1143_v1 = vpop.f32.mrb[1].mxu1 }
 0x295   :  { %v1144_v2 = vadd.f32 %v1143_v1, %v1142_v62  ;;  %v1145_v3 = vpop.f32.mrb[2].mxu1  ;;  %v1306_v62 = vld [vmem:[#allocation13 + $0x38] sm:$0xff]  }
 0x296   :  { %v1146_v4 = vpop.f32.mrb[3].mxu1  ;;  %v1002_v1 = vld [vmem:[#allocation5] sm:$0xff] }
 0x297   :  { %v528_v5 = vadd.f32 %v1144_v2, %v396_v63  ;;  %v1001_v63 = vld [vmem:[#allocation14 + $0x11] ss:$0 sm:$0xff] }
 0x298   :  { %v1024_v2 = vmul.f32 %v1002_v1, %v1001_v63 }
 0x299   :  { %v535_v6 = vrot.slane %v528_v5, 4 }
 0x29b   :  { %v536_v7 = vadd.f32 %v535_v6, %v528_v5  ;;  %v1016_v6 = vmul.f32 %v1002_v1, %v1002_v1 }
 0x29d   :  { %v537_v8 = vrot.slane %v536_v7, 2 }
 0x29f   :  { %v538_v9 = vadd.f32 %v537_v8, %v536_v7  ;;  %v686_v7 = vld [vmem:[#allocation14 + $0x7] ss:$8 sm:$0x3] }
 0x2a0   :  { %v691_v8 = vrot.slane %v686_v7, %v1724_v37 }
 0x2a1   :  { %v539_v10 = vrot.slane %v538_v9, 1 }
 0x2a3   :  { %v540_v11 = vadd.f32 %v539_v10, %v538_v9  ;;  %v695_v9 = vrot.slane %v686_v7, %v1726_v39 }
 0x2a5   :  { %v541_v12 = vmul.f32 0.125, %v540_v11 }
 0x2a7   :  { %v542_v13 = vsub.f32 %v528_v5, %v541_v12 }
 0x2a9   :  { %v543_v14 = vmul.f32 %v542_v13, %v542_v13  ;;  %v551_v24 = vmul.f32 %v542_v13, %v533_v23 }
 0x2ab   :  { %v544_v15 = vrot.slane %v543_v14, 4 }
 0x2ad   :  { %v545_v16 = vadd.f32 %v544_v15, %v543_v14 }
 0x2af   :  { %v546_v17 = vrot.slane %v545_v16, 2 }
 0x2b1   :  { %v547_v18 = vadd.f32 %v546_v17, %v545_v16 }
 0x2b3   :  { %v548_v19 = vrot.slane %v547_v18, 1 }
 0x2b5   :  { %v549_v20 = vadd.f32 %v548_v19, %v547_v18 }
 0x2b7   :  { %v550_v21 = vmul.f32 0.125, %v549_v20 }
 0x2b9   :  { %v552_v22 = vadd.f32 1e-05, %v550_v21 }
 0x2bb   :  { %1311 = vrsqrt.f32 %v552_v22 }
 0x2bc   :  { %1313 = vlog2.f32 %v1001_v63 }
 0x2c5   :  { %v1312_v25 = vpop.eup %1311 }
 0x2c6   :  { %v554_v27 = vmul.f32 %v1312_v25, %v551_v24  ;;  %v1314_v3 = vpop.eup %1313 }
 0x2c7   :  { %v1004_v4 = vmul.f32 0.6931472, %v1314_v3 }
 0x2c8   :  { %v555_v28 = vadd.f32 %v554_v27, %v534_v26 }
 0x2c9   :  { %v1006_v5 = vsel %vm1005_vm5, %v1004_v4, 0.0 }
 0x2ca   :  { %vm556_vm3 = vcmp.ge.f32.partialorder %v555_v28, 0.0  ;;  %v557_v29 = vmul.f32 0.01, %v555_v28  ;;  %1007 = vadd.xlane.f32.xlu0 %v1006_v5 }
 0x2cc   :  { %v558_v30 = vsel %vm556_vm3, %v555_v28, %v557_v29  ;;  %v859_v28 = vld [vmem:[#allocation14 + $0x10] ss:$0 sm:$0xff] }
 0x2cd   :  { %v559_v31 = vpack.c.bf16 %v558_v30, %v558_v30 }
 0x2ce   :  { %1017 = vadd.xlane.f32.xlu0 %v1016_v6 }
 0x2cf   :  { %1196 = vmatmul.mubr.bf16.vlgmr.msra.gmra.mrb[4].mxu0 %v559_v31 }
 0x2d0   :  { %1158 = vmatpush3.bf16.msra.mxu0 %v1292_v40 }
 0x2d1   :  { %1159 = vmatprep.subr.bf16.mxu0 %v1293_v41  ;;  %v997_v41 = vand.u32 127, %v156_v35 }
 0x2d3   :  { %vm998_vm8 = vcmp.eq.s32.totalorder %v997_v41, 10  ;;  %vm1026_vm9 = vcmp.eq.s32.totalorder %v997_v41, 8  ;;  %vm1029_vm10 = vcmp.eq.s32.totalorder %v997_v41, 9 }
 0x2d4   :  { %1160 = vmatpush3.bf16.msra.mxu0 %v1294_v42 }
 0x2d5   :  { %1161 = vmatprep.subr.bf16.mxu0 %v1295_v43 }
 0x2d8   :  { %1162 = vmatpush3.bf16.msra.mxu0 %v1296_v44 }
 0x2d9   :  { %1163 = vmatprep.subr.bf16.mxu0 %v1297_v45 }
 0x2dc   :  { %1164 = vmatpush3.bf16.msra.mxu0 %v1298_v46 }
 0x2dd   :  { %1165 = vmatprep.subr.bf16.mxu0 %v1299_v47 }
 0x2e0   :  { %1166 = vmatpush3.bf16.msra.mxu0 %v1300_v48 }
 0x2e1   :  { %1167 = vmatprep.subr.bf16.mxu0 %v1301_v0 }
 0x2e4   :  { %1168 = vmatpush3.bf16.msra.mxu0 %v1302_v49 }
 0x2e5   :  { %1169 = vmatprep.subr.bf16.mxu0 %v1303_v59 }
 0x2e8   :  { %1170 = vmatpush3.bf16.msra.mxu0 %v1304_v60 }
 0x2e9   :  { %1171 = vmatprep.subr.bf16.mxu0 %v1305_v61 }
 0x2ec   :  { %1172 = vmatpush3.bf16.msra.mxu0 %v1306_v62 }
 0x357   :  { %v1008_v22 = vpop.xlane.xlu0 %1007 }
 0x358   :  { %v1009_v37 = vrot.slane %v1008_v22, 4 }
 0x35a   :  { %v1010_v23 = vadd.f32 %v1009_v37, %v1008_v22 }
 0x35b   :  { %v1018_v34 = vpop.xlane.xlu0 %1017 }
 0x35c   :  { %v1011_v39 = vrot.slane %v1010_v23, 2  ;;  %v1019_v36 = vmul.f32 -0.5, %v1018_v34 }
 0x35e   :  { %v1012_v24 = vadd.f32 %v1011_v39, %v1010_v23 }
 0x360   :  { %v1013_v25 = vrot.slane %v1012_v24, 1 }
 0x362   :  { %v1014_v26 = vadd.f32 %v1013_v25, %v1012_v24 }
 0x364   :  { %1199 = vpush %v1014_v26 }
 0x395   :  { %s1200_s7 = spop %1199 }
 0x396   :  { %v1020_v38 = vstv %s1200_s7  ;;  %s1023_s10 = sadd.f32 5.675754, %s1200_s7 }
 0x397   :  { %v1021_v40 = vsub.f32 %v1019_v36, %v1020_v38 }
 0x398   :  { %v1030_v46 = vstv %s1023_s10 }
 0x399   :  { %v1125_v42 = vadd.f32 -3.675754, %v1021_v40  ;;  %v1031_v0 = vsel %vm1029_vm10, %v1030_v46, 0.0 }
 0x39b   :  { %v1027_v47 = vsel %vm1026_vm9, %v1125_v42, 0.0 }
 0x3a2   :  { %v659_v51 = vpop.f32.mrb[4].mxu0 }
 0x3a3   :  { %v660_v52 = vadd.f32 %v659_v51, %v576_v50  ;;  %v1197_v53 = vpop.f32.mrb[5].mxu0 }
 0x3a4   :  { %v662_v54 = vpop.f32.mrb[6].mxu0 }
 0x3a5   :  { %vm665_vm4 = vcmp.ge.f32.partialorder %v660_v52, 0.0  ;;  %v666_v55 = vmul.f32 0.01, %v660_v52  ;;  %v1198_v56 = vpop.f32.mrb[7].mxu0 }
 0x3a7   :  { %v667_v57 = vsel %vm665_vm4, %v660_v52, %v666_v55 }
 0x3a8   :  { %v668_v58 = vpack.c.bf16 %v667_v57, %v667_v57 }
 0x3aa   :  { %811 = vmatmul.mubr.bf16.vlgmr.msra.gmra.mrb[4].mxu1 %v668_v58 }
 0x47d   :  { %v812_v10 = vpop.f32.mrb[4].mxu1 }
 0x47e   :  { %v813_v11 = vadd.f32 %v812_v10, %v691_v8  ;;  %v814_v12 = vpop.f32.mrb[5].mxu1 }
 0x47f   :  { %v815_v13 = vadd.f32 %v814_v12, %v695_v9  ;;  %v816_v14 = vpop.f32.mrb[6].mxu1 }
 0x480   :  { %vm819_vm6 = vcmp.ge.f32.partialorder %v813_v11, 0.0  ;;  %v821_v15 = vmul.f32 0.01, %v813_v11  ;;  %v817_v16 = vpop.f32.mrb[7].mxu1 }
 0x481   :  { %vm820_vm7 = vcmp.ge.f32.partialorder %v815_v13, 0.0  ;;  %v822_v17 = vmul.f32 0.01, %v815_v13 }
 0x482   :  { %v823_v18 = vsel %vm819_vm6, %v813_v11, %v821_v15 }
 0x483   :  { %v824_v19 = vsel %vm820_vm7, %v815_v13, %v822_v17  ;;  %v825_v21 = vpack.c.bf16 %v823_v18, %v823_v18 }
 0x484   :  { %v826_v20 = vpack.c.bf16 %v824_v19, %v824_v19 }
 0x486   :  { %988 = vmatprep.mubr.bf16.mxu0 %v826_v20 }
 0x487   :  { %989 = vmatmul.mubr.bf16.vlgmr.msra.gmra.mrb[8].mxu0 %v825_v21 }
 0x55a   :  { %v1173_v27 = vpop.f32.mrb[8].mxu0 }
 0x55b   :  { %v1174_v29 = vpop.f32.mrb[9].mxu0 }
 0x55c   :  { %v1175_v30 = vadd.f32 %v1174_v29, %v1173_v27  ;;  %v1176_v31 = vpop.f32.mrb[10].mxu0 }
 0x55d   :  { %v1177_v32 = vpop.f32.mrb[11].mxu0 }
 0x55e   :  { %v991_v33 = vadd.f32 %v1175_v30, %v859_v28 }
 0x560   :  { %1315 = vtanh.f32 %v991_v33 }
 0x56a   :  { %v1316_v43 = vpop.eup %1315 }
 0x56b   :  { %v1000_v44 = vsel %vm998_vm8, %v991_v33, %v1316_v43 }
 0x56c   :  { %v1025_v45 = vadd.f32 %v1024_v2, %v1000_v44 }
 0x56e   :  { %v1028_v48 = vadd.f32 %v1027_v47, %v1025_v45 }
 0x570   :  { %v1032_v49 = vadd.f32 %v1031_v0, %v1028_v48 }
 0x572   :  { %1033 = vst [vmem:[#allocation16] sm:$0xff] %v1032_v49 }
 0x573   :  { %1504 = shalt.err (!%p1501_p12)
}
 0x574   :  { %s1505_s15 = scalar_lea.hbm %s1758_s8, 128 }
 0x575   :  { %p1506_p13 = scmp.ne.s32.totalorder %s1758_s8, %s1505_s15  ;;  %p1509_p0 = scmp.lt.u32.totalorder %s1505_s15, %s1758_s8 }
 0x577   :  { %p1511_p1 = pnand %p1509_p0, %p1506_p13 }
 0x579   :  { %1514 = shalt.err (!%p1511_p1)
}
 0x57a   :  { %1043 = dma.vmem_to_hbm [thread:$0]  %s1041_s30, 128, %s1758_s8, [#allocation4]  }
 0x57b   :  { %1525 = dma.done.wait [#allocation4], 128  }
 0x57c   :  { %1526 = vsyncadd [#allocation4], 4294967168 }
 0x57d   :  { %1047 = vsyncpa [#allocation3], 1 }
 0x57e   :  { %1048 = vsyncpa [#allocation6], 1 }
 0x57f   :  { %1049 = vsyncpa [#allocation9], 1 }
 0x580   :  { %1050 = vsyncpa [#allocation12], 1 }
 0x581   :  { %1051 = vsyncpa [#allocation15], 1 }
 0x582   :  { %1052 = vsyncpa [#allocation4], 1 }

</bundles_post_ra>
